<compile_context>
chip_gen: v5e
topology: v5e:2x2
jax: 0.10.0
libtpu: 0.0.40
codegen_flags: <defaults>
</compile_context>

<pallas_src>
import functools

import jax
import jax.numpy as jnp
from jax.experimental import pallas as pl
from jax.experimental.pallas import tpu as pltpu

HIDDEN = 24
LANE = 128          # lane width (hidden dim padded to this)
SUBLANE = 8         # fp32 sublane width (batch / K / output dims padded to this)


def _round_up(n, m):
    return (n + m - 1) // m * m


# --------------------------------------------------------------------------
# Kernel: fused 3-layer MLP on a (TB, ·) batch tile.
# Weight/bias refs are whole (padded) tensors, resident in VMEM across steps.
# --------------------------------------------------------------------------
def mlp_kernel(x_ref, w1_ref, w2_ref, b2_ref, w3_ref, b3_ref, o_ref):
    # x tile (TB, 8): 4 real features + ones column (folded layer1 bias) + pad.
    x = x_ref[...].astype(jnp.bfloat16)

    # layer1 + ReLU: (TB,8)@(8,128); bias already folded via the ones column.
    h1 = jnp.dot(x, w1_ref[...], preferred_element_type=jnp.float32)
    h1 = jnp.maximum(h1, 0.0)

    # layer2 + ReLU: (TB,128)@(128,128)
    h2 = jnp.dot(h1.astype(jnp.bfloat16), w2_ref[...],
                 preferred_element_type=jnp.float32) + b2_ref[...]
    h2 = jnp.maximum(h2, 0.0)

    # layer3 logits: (TB,128)@(128,8) -> narrow (TB,8) store (16x less writeback)
    h3 = jnp.dot(h2.astype(jnp.bfloat16), w3_ref[...],
                 preferred_element_type=jnp.float32) + b3_ref[...]
    o_ref[...] = h3.astype(o_ref.dtype)


# --------------------------------------------------------------------------
# One-time host-side parameter padding / packing.
#   input  4 -> 8  (one extra column holds the folded layer1 bias)
#   hidden 24 -> 128 (lane aligned)
#   output 3 -> 8  (sublane aligned; narrow store, sliced by the wrapper)
# Weights are stored bf16 (MXU-native); biases stay f32.
# --------------------------------------------------------------------------
def prepare_params(params, input_size, output_size):
    pad_in = _round_up(input_size + 1, SUBLANE)     # 4 (+1 ones col) -> 8
    pad_h = _round_up(HIDDEN, LANE)                 # 24 -> 128
    pad_out = _round_up(output_size, SUBLANE)       # 3  -> 8

    w1 = jnp.zeros((pad_in, pad_h), jnp.float32)
    w1 = w1.at[:input_size, :HIDDEN].set(params["w1"])
    w1 = w1.at[input_size, :HIDDEN].set(params["b1"][0])   # folded bias row

    w2 = jnp.zeros((pad_h, pad_h), jnp.float32)
    w2 = w2.at[:HIDDEN, :HIDDEN].set(params["w2"])
    b2 = jnp.zeros((1, pad_h), jnp.float32).at[:, :HIDDEN].set(params["b2"])

    w3 = jnp.zeros((pad_h, pad_out), jnp.float32)
    w3 = w3.at[:HIDDEN, :output_size].set(params["w3"])
    b3 = jnp.zeros((1, pad_out), jnp.float32).at[:, :output_size].set(params["b3"])

    return {
        "w1": w1.astype(jnp.bfloat16),
        "w2": w2.astype(jnp.bfloat16),
        "b2": b2,
        "w3": w3.astype(jnp.bfloat16),
        "b3": b3,
    }


# --------------------------------------------------------------------------
# Wrapper: batch-tiled pallas_call with resident weights. Fully jitted so the
# input pad and output slice fuse with the kernel call.
# --------------------------------------------------------------------------
@functools.partial(jax.jit, static_argnames=("output_size", "tile_b"))
def network_forward(x, padded_params, output_size, tile_b=4096):
    w1 = padded_params["w1"]
    w2, b2 = padded_params["w2"], padded_params["b2"]
    w3, b3 = padded_params["w3"], padded_params["b3"]

    B, F = x.shape
    pad_in = w1.shape[0]
    pad_out = w3.shape[1]

    # Batch tile: multiple of 8, capped at ceil(B/2) so the grid has >=2
    # "parallel" steps when possible (keeps both v7x TensorCores busy).
    b8 = _round_up(B, SUBLANE)
    half = _round_up((b8 + 1) // 2, SUBLANE)
    tb = max(SUBLANE, min(_round_up(tile_b, SUBLANE), half))
    pb = _round_up(B, tb)

    # Augment x with the ones column (folded layer1 bias), pad features to
    # pad_in and batch to a multiple of tb. Padded rows are zeros -> discarded.
    ones_col = jnp.ones((B, 1), x.dtype)
    x_aug = jnp.concatenate([x, ones_col], axis=1)
    xp = jnp.pad(x_aug, ((0, pb - B), (0, pad_in - (F + 1))))

    grid = (pb // tb,)
    batch_map = lambda i: (i, 0)      # x / output march over batch tiles
    const_map = lambda i: (0, 0)      # weights & biases stay VMEM-resident

    out = pl.pallas_call(
        mlp_kernel,
        out_shape=jax.ShapeDtypeStruct((pb, pad_out), jnp.float32),
        grid=grid,
        in_specs=[
            pl.BlockSpec((tb, pad_in), batch_map),
            pl.BlockSpec(w1.shape, const_map),
            pl.BlockSpec(w2.shape, const_map),
            pl.BlockSpec(b2.shape, const_map),
            pl.BlockSpec(w3.shape, const_map),
            pl.BlockSpec(b3.shape, const_map),
        ],
        out_specs=pl.BlockSpec((tb, pad_out), batch_map),
        compiler_params=pltpu.CompilerParams(
            dimension_semantics=("parallel",),
            vmem_limit_bytes=32 * 1024 * 1024,
        ),
    )(xp, w1, w2, b2, w3, b3)

    # Fuses into this jit; only an 8-lane-wide residual instead of 128.
    return out[:B, :output_size]


# --------------------------------------------------------------------------
# Init mimicking PyTorch nn.Linear default: U(-1/sqrt(fan_in), 1/sqrt(fan_in)).
# Weights stored as (in, out) so the kernel computes x @ W + b.
# --------------------------------------------------------------------------
def init_params(key, input_size, output_size, hidden=HIDDEN):
    def linear_init(k, fan_in, fan_out):
        kw, kb = jax.random.split(k)
        bound = 1.0 / jnp.sqrt(fan_in)
        w = jax.random.uniform(kw, (fan_in, fan_out), jnp.float32, -bound, bound)
        b = jax.random.uniform(kb, (1, fan_out), jnp.float32, -bound, bound)
        return w, b

    k1, k2, k3 = jax.random.split(key, 3)
    w1, b1 = linear_init(k1, input_size, hidden)
    w2, b2 = linear_init(k2, hidden, hidden)
    w3, b3 = linear_init(k3, hidden, output_size)
    return {"w1": w1, "b1": b1, "w2": w2, "b2": b2, "w3": w3, "b3": b3}


def reference_forward(x, params):
    h1 = jnp.maximum(x @ params["w1"] + params["b1"], 0.0)
    h2 = jnp.maximum(h1 @ params["w2"] + params["b2"], 0.0)
    return h2 @ params["w3"] + params["b3"]


if __name__ == "__main__":
    INPUT_SIZE = 4    # Iris: 4 features
    OUTPUT_SIZE = 3   # 3 classes

    key = jax.random.PRNGKey(0)
    kx1, kx2, kx3, kp = jax.random.split(key, 4)

    params = init_params(kp, INPUT_SIZE, OUTPUT_SIZE)
    pparams = prepare_params(params, INPUT_SIZE, OUTPUT_SIZE)

    # bf16 matmuls (f32 accumulation) -> classifier-logit tolerance vs f32 ref.
    ATOL = RTOL = 5e-2

    # 1) Small batch, single grid step.
    x_small = jax.random.normal(kx1, (8, INPUT_SIZE), dtype=jnp.float32)
    out_small = jax.block_until_ready(
        network_forward(x_small, pparams, OUTPUT_SIZE))
    ref_small = reference_forward(x_small, params)
    assert out_small.shape == (8, OUTPUT_SIZE), out_small.shape
    assert jnp.allclose(out_small, ref_small, atol=ATOL, rtol=RTOL), \
        "mismatch vs reference (small batch)"

    # 2) Batch not a multiple of the tile, small tile -> multi-step grid + padding.
    x_mid = jax.random.normal(kx2, (40, INPUT_SIZE), dtype=jnp.float32)
    out_mid = jax.block_until_ready(
        network_forward(x_mid, pparams, OUTPUT_SIZE, tile_b=16))
    ref_mid = reference_forward(x_mid, params)
    assert out_mid.shape == (40, OUTPUT_SIZE), out_mid.shape
    assert jnp.allclose(out_mid, ref_mid, atol=ATOL, rtol=RTOL), \
        "mismatch vs reference (tiled batch)"

    # 3) Larger batch, default tile -> tile auto-capped so grid has 2 steps
    #    (both v7x TensorCores active via dimension_semantics=("parallel",)).
    x_big = jax.random.normal(kx3, (600, INPUT_SIZE), dtype=jnp.float32)
    out_big = jax.block_until_ready(
        network_forward(x_big, pparams, OUTPUT_SIZE))
    ref_big = reference_forward(x_big, params)
    assert out_big.shape == (600, OUTPUT_SIZE), out_big.shape
    assert jnp.allclose(out_big, ref_big, atol=ATOL, rtol=RTOL), \
        "mismatch vs reference (large batch)"

    print("KERNEL_OK")
</pallas_src>

<mosaic_0001>
module attributes {stable_mosaic.version = 11 : i64} {
  func.func @mlp_kernel(%arg0: i32, %arg1: memref<8x8xf32, #tpu.memory_space<vmem>>, %arg2: memref<8x128xbf16, #tpu.memory_space<vmem>>, %arg3: memref<128x128xbf16, #tpu.memory_space<vmem>>, %arg4: memref<1x128xf32, #tpu.memory_space<vmem>>, %arg5: memref<128x8xbf16, #tpu.memory_space<vmem>>, %arg6: memref<1x8xf32, #tpu.memory_space<vmem>>, %arg7: memref<8x8xf32, #tpu.memory_space<vmem>>) attributes {dimension_semantics = [#tpu.dimension_semantics<parallel>], iteration_bounds = array<i64: 1>, scalar_prefetch = 0 : i64, scratch_operands = 0 : i64, tpu.core_type = #tpu.core_type<tc>, window_params = [{transform_indices = @transform_0, window_bounds = array<i64: 8, 8>}, {pipeline_mode = #tpu.pipeline_mode<synchronous>, transform_indices = @transform_1, window_bounds = array<i64: 8, 128>}, {pipeline_mode = #tpu.pipeline_mode<synchronous>, transform_indices = @transform_2, window_bounds = array<i64: 128, 128>}, {pipeline_mode = #tpu.pipeline_mode<synchronous>, transform_indices = @transform_3, window_bounds = array<i64: 1, 128>}, {pipeline_mode = #tpu.pipeline_mode<synchronous>, transform_indices = @transform_4, window_bounds = array<i64: 128, 8>}, {pipeline_mode = #tpu.pipeline_mode<synchronous>, transform_indices = @transform_5, window_bounds = array<i64: 1, 8>}, {transform_indices = @transform_6, window_bounds = array<i64: 8, 8>}]} {
    %c0 = arith.constant 0 : index
    %c0_0 = arith.constant 0 : index
    %0 = vector.load %arg1[%c0, %c0_0] : memref<8x8xf32, #tpu.memory_space<vmem>>, vector<8x8xf32>
    %1 = arith.truncf %0 : vector<8x8xf32> to vector<8x8xbf16>
    %c0_1 = arith.constant 0 : index
    %c0_2 = arith.constant 0 : index
    %2 = vector.load %arg2[%c0_1, %c0_2] : memref<8x128xbf16, #tpu.memory_space<vmem>>, vector<8x128xbf16>
    %cst = arith.constant dense<0.000000e+00> : vector<8x128xf32>
    %3 = tpu.matmul %1, %2, %cst {dimension_numbers = #tpu.dot_dimension_numbers<[1], [0], [0], [1], [0, 0, 1, 1], [], []>} : vector<8x8xbf16>, vector<8x128xbf16>, vector<8x128xf32> -> vector<8x128xf32>
    %cst_3 = arith.constant 0.000000e+00 : f32
    %4 = vector.broadcast %cst_3 : f32 to vector<8x128xf32>
    %5 = arith.maximumf %3, %4 : vector<8x128xf32>
    %6 = arith.truncf %5 : vector<8x128xf32> to vector<8x128xbf16>
    %c0_4 = arith.constant 0 : index
    %c0_5 = arith.constant 0 : index
    %7 = vector.load %arg3[%c0_4, %c0_5] : memref<128x128xbf16, #tpu.memory_space<vmem>>, vector<128x128xbf16>
    %cst_6 = arith.constant dense<0.000000e+00> : vector<8x128xf32>
    %8 = tpu.matmul %6, %7, %cst_6 {dimension_numbers = #tpu.dot_dimension_numbers<[1], [0], [0], [1], [0, 0, 1, 1], [], []>} : vector<8x128xbf16>, vector<128x128xbf16>, vector<8x128xf32> -> vector<8x128xf32>
    %c0_7 = arith.constant 0 : index
    %c0_8 = arith.constant 0 : index
    %9 = vector.load %arg4[%c0_7, %c0_8] : memref<1x128xf32, #tpu.memory_space<vmem>>, vector<1x128xf32>
    %10 = vector.broadcast %9 : vector<1x128xf32> to vector<8x128xf32>
    %11 = arith.addf %8, %10 : vector<8x128xf32>
    %cst_9 = arith.constant 0.000000e+00 : f32
    %12 = vector.broadcast %cst_9 : f32 to vector<8x128xf32>
    %13 = arith.maximumf %11, %12 : vector<8x128xf32>
    %14 = arith.truncf %13 : vector<8x128xf32> to vector<8x128xbf16>
    %c0_10 = arith.constant 0 : index
    %c0_11 = arith.constant 0 : index
    %15 = vector.load %arg5[%c0_10, %c0_11] : memref<128x8xbf16, #tpu.memory_space<vmem>>, vector<128x8xbf16>
    %cst_12 = arith.constant dense<0.000000e+00> : vector<8x8xf32>
    %16 = tpu.matmul %14, %15, %cst_12 {dimension_numbers = #tpu.dot_dimension_numbers<[1], [0], [0], [1], [0, 0, 1, 1], [], []>} : vector<8x128xbf16>, vector<128x8xbf16>, vector<8x8xf32> -> vector<8x8xf32>
    %c0_13 = arith.constant 0 : index
    %c0_14 = arith.constant 0 : index
    %17 = vector.load %arg6[%c0_13, %c0_14] : memref<1x8xf32, #tpu.memory_space<vmem>>, vector<1x8xf32>
    %18 = vector.broadcast %17 : vector<1x8xf32> to vector<8x8xf32>
    %19 = arith.addf %16, %18 : vector<8x8xf32>
    %c0_15 = arith.constant 0 : index
    %c0_16 = arith.constant 0 : index
    %20 = vector.load %arg7[%c0_15, %c0_16] : memref<8x8xf32, #tpu.memory_space<vmem>>, vector<8x8xf32>
    tpu.vector_store %arg7[%c0_15, %c0_16], %19 {strides = array<i32>} : memref<8x8xf32, #tpu.memory_space<vmem>>, vector<8x8xf32>,
    return
  }
  func.func @transform_0(%arg0: i32) -> (i32, i32) {
    %c0_i32 = arith.constant 0 : i32
    %c0_i32_0 = arith.constant 0 : i32
    return %arg0, %c0_i32 : i32, i32
  }
  func.func @transform_1(%arg0: i32) -> (i32, i32) {
    %c0_i32 = arith.constant 0 : i32
    %c0_i32_0 = arith.constant 0 : i32
    %c0_i32_1 = arith.constant 0 : i32
    return %c0_i32, %c0_i32_0 : i32, i32
  }
  func.func @transform_2(%arg0: i32) -> (i32, i32) {
    %c0_i32 = arith.constant 0 : i32
    %c0_i32_0 = arith.constant 0 : i32
    %c0_i32_1 = arith.constant 0 : i32
    return %c0_i32, %c0_i32_0 : i32, i32
  }
  func.func @transform_3(%arg0: i32) -> (i32, i32) {
    %c0_i32 = arith.constant 0 : i32
    %c0_i32_0 = arith.constant 0 : i32
    %c0_i32_1 = arith.constant 0 : i32
    return %c0_i32, %c0_i32_0 : i32, i32
  }
  func.func @transform_4(%arg0: i32) -> (i32, i32) {
    %c0_i32 = arith.constant 0 : i32
    %c0_i32_0 = arith.constant 0 : i32
    %c0_i32_1 = arith.constant 0 : i32
    return %c0_i32, %c0_i32_0 : i32, i32
  }
  func.func @transform_5(%arg0: i32) -> (i32, i32) {
    %c0_i32 = arith.constant 0 : i32
    %c0_i32_0 = arith.constant 0 : i32
    %c0_i32_1 = arith.constant 0 : i32
    return %c0_i32, %c0_i32_0 : i32, i32
  }
  func.func @transform_6(%arg0: i32) -> (i32, i32) {
    %c0_i32 = arith.constant 0 : i32
    %c0_i32_0 = arith.constant 0 : i32
    return %arg0, %c0_i32 : i32, i32
  }
}

</mosaic_0001>

<bundles_post_ra>
// kernel: network_forward.1
= control target key start
LH: loop header
LB: loop body
LE: loop exit
PB: predicated region body
PF: predicated region fallthrough
CT: control target
= control target key end

     0   :  { %vm31_vm0 = vcmask 1043456   ;;  %vm27_vm1 = vcmask 64512   ;;  %s402_s1 = inlined_call_operand.vmem [shape: bf16[8,128], index: 1, kind: input, shape index: {}]   ;;  %s403_s0 = inlined_call_operand.vmem [shape: f32[8,8], index: 0, kind: input, shape index: {}]   ;;  %s404_s2 = inlined_call_operand.vmem [shape: bf16[128,128], index: 2, kind: input, shape index: {}]   ;;  %s405_s3 = inlined_call_operand.vmem [shape: f32[1,128], index: 3, kind: input, shape index: {}]   ;;  %s406_s4 = inlined_call_operand.vmem [shape: bf16[128,8], index: 4, kind: input, shape index: {}]   ;;  %s407_s5 = inlined_call_operand.vmem [shape: f32[1,8], index: 5, kind: input, shape index: {}]   ;;  %s408_s6 = inlined_call_operand.vmem [shape: f32[8,8], index: 6, kind: output, shape index: {}]  }
   0x1   :  { %v26_v0 = vld [vmem:[%s402_s1] sm:$0xf]  ;;  %v291_v2 = vld [vmem:[%s404_s2 + $0x38] sm:$0xff]  ;;  %v290_v5 = vld [vmem:[%s404_s2 + $0x30] sm:$0xff] }
   0x2   :  { %v24_v1 = vld [vmem:[%s403_s0] sm:$0xff]  ;;  %v33_v3 = vsel %vm31_vm0, %v26_v0, 0  ;;  %118 = vmatpush.bf16.msra.mxu1 %v291_v2  ;;  %v289_v6 = vld [vmem:[%s404_s2 + $0x28] sm:$0xff]  ;;  %v287_v8 = vld [vmem:[%s404_s2 + $0x18] sm:$0xff] }
   0x3   :  { %v25_v4 = vpack.c.bf16 %v24_v1, %v24_v1  ;;  %42 = vmatpush.bf16.msra.mxu0 %v33_v3  ;;  %v288_v7 = vld [vmem:[%s404_s2 + $0x20] sm:$0xff]  ;;  %v286_v9 = vld [vmem:[%s404_s2 + $0x10] sm:$0xff]  ;;  %v285_v10 = vld [vmem:[%s404_s2 + $0x8] sm:$0xff] }
   0x4   :  { %v284_v11 = vld [vmem:[%s404_s2] sm:$0xff]  ;;  %v299_v12 = vld [vmem:[%s406_s4 + $0x38] sm:$0xff]  ;;  %v298_v13 = vld [vmem:[%s406_s4 + $0x30] sm:$0xff] }
   0x5   :  { %201 = vmatpush.bf16.msra.mxu2 %v299_v12  ;;  %v297_v14 = vld [vmem:[%s406_s4 + $0x28] sm:$0xff]  ;;  %v296_v15 = vld [vmem:[%s406_s4 + $0x20] sm:$0xff]  ;;  %v295_v16 = vld [vmem:[%s406_s4 + $0x18] sm:$0xff] }
   0x6   :  { %219 = vmatmul.msk.bf16.vlgmr.msra.gmra.mxu0 %vm27_vm1, %v25_v4  ;;  %119 = vmatpush.bf16.msra.mxu1 %v290_v5  ;;  %v294_v17 = vld [vmem:[%s406_s4 + $0x10] sm:$0xff]  ;;  %v293_v22 = vld [vmem:[%s406_s4 + $0x8] sm:$0xff]  ;;  %v292_v23 = vld [vmem:[%s406_s4] sm:$0xff] }
   0x7   :  { %v300_v24 = vld [vmem:[%s405_s3] ss:$0 sm:$0xff] }
   0x8   :  { %v301_v30 = vld [vmem:[%s407_s5] ss:$0 sm:$0xff] }
   0x9   :  { %202 = vmatpush.bf16.msra.mxu2 %v298_v13 }
   0xa   :  { %120 = vmatpush.bf16.msra.mxu1 %v289_v6 }
   0xd   :  { %203 = vmatpush.bf16.msra.mxu2 %v297_v14 }
   0xe   :  { %121 = vmatpush.bf16.msra.mxu1 %v288_v7 }
  0x11   :  { %204 = vmatpush.bf16.msra.mxu2 %v296_v15 }
  0x12   :  { %122 = vmatpush.bf16.msra.mxu1 %v287_v8 }
  0x15   :  { %205 = vmatpush.bf16.msra.mxu2 %v295_v16 }
  0x16   :  { %123 = vmatpush.bf16.msra.mxu1 %v286_v9 }
  0x19   :  { %206 = vmatpush.bf16.msra.mxu2 %v294_v17 }
  0x1a   :  { %124 = vmatpush.bf16.msra.mxu1 %v285_v10 }
  0x1d   :  { %207 = vmatpush.bf16.msra.mxu2 %v293_v22 }
  0x1e   :  { %125 = vmatpush.bf16.msra.mxu1 %v284_v11 }
  0x21   :  { %208 = vmatpush.bf16.msra.mxu2 %v292_v23 }
  0x83   :  { %v44_v18 = vpop.f32.mrf.mxu0 }
  0x84   :  { %v48_v19 = vmax.f32 %v44_v18, 0.0 }
  0x86   :  { %v49_v20 = vpack.c.bf16 %v48_v19, %v48_v19 }
  0x88   :  { %126 = vmatmul.bf16.vlgmr.msra.gmra.mxu1 %v49_v20 }
  0x8b   :  { %v46_v21 = vpop.f32.mrf.mxu0 }
 0x105   :  { %v127_v25 = vpop.f32.mrf.mxu1 }
 0x106   :  { %v128_v26 = vadd.f32 %v300_v24, %v127_v25 }
 0x108   :  { %v131_v27 = vmax.f32 %v128_v26, 0.0 }
 0x10a   :  { %v132_v28 = vpack.c.bf16 %v131_v27, %v131_v27 }
 0x10c   :  { %209 = vmatmul.bf16.vlgmr.msra.gmra.mxu2 %v132_v28 }
 0x10d   :  { %v129_v29 = vpop.f32.mrf.mxu1 }
 0x18f   :  { %v210_v31 = vpop.f32.mrf.mxu2 }
 0x190   :  { %v211_v32 = vadd.f32 %v301_v30, %v210_v31 }
 0x192   :  { %214 = vst.msk [vmem:[%s408_s6] sm:$0xff] %vm27_vm1, %v211_v32 }
 0x197   :  { %v212_v33 = vpop.f32.mrf.mxu2 }

</bundles_post_ra>
